<compile_context>
chip_gen: v5e
topology: v5e:2x2
jax: 0.10.0
libtpu: 0.0.40
codegen_flags: <defaults>
</compile_context>

<pallas_src>
import numpy as np
import jax
import jax.numpy as jnp
from jax import lax
from jax.experimental import pallas as pl
from jax.experimental.pallas import tpu as pltpu


def _round_up(x, m):
    return ((x + m - 1) // m) * m


def _round_down(x, m):
    return (x // m) * m


def _tpu_kind():
    try:
        return jax.devices()[0].device_kind.lower()
    except Exception:
        return ""


def graph_prompt_feature_weighted_sum(graph_embedding, graph_len, weight,
                                      *, max_n=None, rows_per_step=None):
    """Fused equivalent of graph_prompt_layer_feature_weighted_sum.forward."""
    graph_len = jnp.asarray(graph_len).reshape(-1).astype(jnp.int32)
    B = int(graph_len.shape[0])
    N, D = (int(s) for s in graph_embedding.shape)
    weight = jnp.asarray(weight).reshape(1, D)
    out_dtype = jnp.promote_types(graph_embedding.dtype, weight.dtype)

    if max_n is None:
        # TODO(synk): host sync; under jit with a traced graph_len pass max_n= explicitly.
        max_n = int(np.max(np.asarray(graph_len))) if B > 0 else 0
    max_n = int(max_n)
    if B == 0 or max_n == 0:
        # torch: mean over an empty node axis -> NaN; preserve that behaviour.
        return jnp.full((B, D), jnp.nan, dtype=out_dtype)
    inv_max_n = 1.0 / float(max_n)

    # Per-graph row ranges [starts[b], ends[b]) in the flat (N, D) embedding.
    ends = jnp.cumsum(graph_len)
    starts = ends - graph_len

    # ---- small-D row packing: k consecutive rows -> one 128-wide lane row ----
    k = max(1, 128 // D) if D < 128 else 1
    while k > 1 and B * k > 1024:      # keep the one-hot sublane count bounded
        k //= 2
    Dp = k * D                          # packed lane width
    Np = N // k                         # number of packed super-rows
    N_main = Np * k
    rem = N - N_main                    # < k leftover rows (plain-JAX fixup below)
    BQ = B * k                          # one-hot rows: (graph, sub-position) pairs

    # Shifted windows so membership of sub-position j is one integer compare:
    #   row t'*k + j in graph b  <=>  starts[b]-j <= t'*k < ends[b]-j
    jpos = jnp.arange(k, dtype=jnp.int32)
    starts_adj = (starts[:, None] - jpos[None, :]).reshape(BQ, 1).astype(jnp.int32)
    ends_adj = (ends[:, None] - jpos[None, :]).reshape(BQ, 1).astype(jnp.int32)
    w_tiled = jnp.tile(weight.astype(jnp.float32), (1, k))        # (1, k*D)

    # Matmul precision: exact f32 segment sum for f32 inputs, native bf16 otherwise.
    mm_precision = lax.Precision.HIGHEST if graph_embedding.dtype == jnp.float32 else None

    # ---- chip-aware chunk sizing (laid-out VMEM footprint, not logical bytes) ----
    kind = _tpu_kind()
    is_v7 = ("v7" in kind) or ("tpu7" in kind.replace(" ", ""))
    num_tc = 2 if is_v7 else 1
    vmem_limit = (48 << 20) if is_v7 else (64 << 20)      # v7x VMEM is 64 MiB/TC
    stream_budget = (20 << 20) if is_v7 else (32 << 20)   # x double-buffer + one-hot

    itemsize = jnp.dtype(graph_embedding.dtype).itemsize
    Dp_pad = _round_up(Dp, 128)                 # lane padding of the x block
    BQ_pad = _round_up(BQ, 8)                   # sublane padding of the one-hot
    x_row_bytes = Dp_pad * itemsize
    onehot_row_bytes = BQ_pad * max(itemsize, 4)
    per_row = 2 * x_row_bytes + 2 * onehot_row_bytes   # 2x x (double buffer) + one-hot temps
    # TODO(synk): for very large B the one-hot should additionally be tiled over B.
    if rows_per_step is not None:
        tn = max(1, int(rows_per_step) // k)
    else:
        tn = max(1, stream_budget // per_row)
    tn = max(8, _round_down(tn, 8))             # sublane-dim constraint (multiple of 8)

    if Np > 0:
        if tn >= Np:
            tn = Np                             # single full-extent chunk
        num_chunks = pl.cdiv(Np, tn)
        P = 2 if (num_tc >= 2 and num_chunks >= 2) else 1   # megacore only on v7x
        C = pl.cdiv(num_chunks, P)

        if rem == 0:
            x_main = graph_embedding.reshape(Np, Dp)        # free, contiguous reshape
        else:
            # TODO(synk): this leading-dim slice materializes a copy; pad N to a
            # multiple of k upstream to keep the reshape free.
            x_main = graph_embedding[:N_main].reshape(Np, Dp)

        def kernel(starts_ref, ends_ref, w_ref, x_ref, o_ref):
            p = pl.program_id(0)
            c = pl.program_id(1)

            @pl.when(c == 0)
            def _init():
                o_ref[...] = jnp.zeros_like(o_ref)

            chunk = p * C + c
            row0 = chunk * tn                   # super-row offset of this (unclamped) chunk

            def accumulate(x):
                # Membership at (graph, sub-position) granularity -> (BQ, tn) one-hot.
                g = (row0 + lax.broadcasted_iota(jnp.int32, (1, tn), 1)) * k
                member = (g >= starts_ref[...]) & (g < ends_ref[...])
                onehot = member.astype(x.dtype)             # 0/1 exact in any float dtype
                # Segment-sum on the MXU: (BQ, tn) @ (tn, k*D) -> (BQ, k*D), f32 accumulate.
                o_ref[...] += jnp.dot(onehot, x,
                                      preferred_element_type=jnp.float32,
                                      precision=mm_precision)

            @pl.when(row0 < Np)                 # duplicated / fully-OOB tail chunks do no work
            def _work():
                boundary = row0 + tn > Np

                @pl.when(boundary)              # only the single partial chunk pays for the mask
                def _masked():
                    g_col = row0 + lax.broadcasted_iota(jnp.int32, (tn, 1), 0)
                    x = jnp.where(g_col < Np, x_ref[...], jnp.zeros_like(x_ref[...]))
                    accumulate(x)

                @pl.when(jnp.logical_not(boundary))
                def _interior():
                    accumulate(x_ref[...])

            @pl.when(c == C - 1)
            def _finalize():
                # mean over max_n (incl. zero padding, matching torch) and the per-feature
                # weight -- applied once per graph, not once per node.
                o_ref[...] = o_ref[...] * (w_ref[...] * inv_max_n)

        def x_index_map(p, c):
            chunk = p * C + c
            # Clamp fully-out-of-range tail chunks onto the last real block; their
            # compute is skipped in-kernel by the row0 < Np gate.
            return (jnp.minimum(chunk, num_chunks - 1), 0)

        partials = pl.pallas_call(
            kernel,
            out_shape=jax.ShapeDtypeStruct((P, BQ, Dp), jnp.float32),
            grid_spec=pltpu.PrefetchScalarGridSpec(
                num_scalar_prefetch=0,
                grid=(P, C),
                in_specs=[
                    pl.BlockSpec((BQ, 1), lambda p, c: (0, 0)),   # shifted starts (tiny)
                    pl.BlockSpec((BQ, 1), lambda p, c: (0, 0)),   # shifted ends   (tiny)
                    pl.BlockSpec((1, Dp), lambda p, c: (0, 0)),   # tiled weight   (shared)
                    # Default 2-deep pipeline; the stream is strictly sequential, so
                    # pl.Buffered(3) is only worth its VMEM if DMA is still exposed.
                    pl.BlockSpec((tn, Dp), x_index_map),          # packed node features
                ],
                out_specs=pl.BlockSpec((None, BQ, Dp), lambda p, c: (p, 0, 0)),
            ),
            compiler_params=pltpu.CompilerParams(
                dimension_semantics=("parallel", "arbitrary"),
                vmem_limit_bytes=vmem_limit),
        )(starts_adj, ends_adj, w_tiled, x_main)

        acc = jnp.sum(partials, axis=0)                    # (B*k, k*D); P is 1 or 2
        acc = acc.reshape(B, k, k, D)
        jj = jnp.arange(k)
        out_f32 = acc[:, jj, jj, :].sum(axis=1)            # diagonal over sub-positions -> (B, D)
    else:
        out_f32 = jnp.zeros((B, D), jnp.float32)

    if rem:
        # < k leftover rows: tiny exact plain-JAX correction (<= (k-1) x B x D work).
        tail = graph_embedding[N_main:].astype(jnp.float32)               # (rem, D)
        ridx = N_main + jnp.arange(rem, dtype=jnp.int32)
        tmask = ((ridx[None, :] >= starts[:, None]) &
                 (ridx[None, :] < ends[:, None])).astype(jnp.float32)     # (B, rem)
        out_f32 = out_f32 + jnp.dot(tmask, tail) * (weight.astype(jnp.float32) * inv_max_n)

    return out_f32.astype(out_dtype)


def _split_and_batchify_ref(graph_embedding, graph_len, max_n):
    """Pure-JAX reference of the torch helper (validation only)."""
    lens = graph_len.reshape(-1).astype(jnp.int32)
    ends = jnp.cumsum(lens)
    starts = ends - lens
    pos = jnp.arange(max_n, dtype=jnp.int32)
    idx = starts[:, None] + pos[None, :]
    mask = pos[None, :] < lens[:, None]
    idx = jnp.where(mask, idx, 0)
    return graph_embedding[idx] * mask[:, :, None].astype(graph_embedding.dtype)


if __name__ == "__main__":
    key = jax.random.PRNGKey(0)
    k_emb, k_w, k_emb2, k_emb3 = jax.random.split(key, 4)

    input_dim = 32                                     # D (== module's input_dim)

    # xavier_uniform_ for a (1, input_dim) parameter: fan_in=input_dim, fan_out=1
    bound = float(np.sqrt(6.0 / (input_dim + 1)))
    weight = jax.random.uniform(k_w, (1, input_dim), jnp.float32, -bound, bound)

    def reference(emb, lens, w):
        lens = jnp.asarray(lens).reshape(-1).astype(jnp.int32)
        mx = int(np.max(np.asarray(lens)))
        batched = _split_and_batchify_ref(emb.astype(jnp.float32), lens, mx)
        return jnp.mean(batched * w.astype(jnp.float32), axis=1)

    # Case 1: module-sized example (B=2 graphs, 8 nodes, D=32), f32 exact path.
    graph_len = jnp.array([5, 3], dtype=jnp.int32)
    emb = jax.random.normal(k_emb, (8, input_dim), jnp.float32)
    out = jax.block_until_ready(graph_prompt_feature_weighted_sum(emb, graph_len, weight))
    np.testing.assert_allclose(np.asarray(out), np.asarray(reference(emb, graph_len, weight)),
                               rtol=1e-5, atol=1e-5)

    # Case 2: multi-chunk grid, partial boundary chunk, and N % k remainder rows.
    graph_len2 = jnp.array([13, 7, 25, 25], dtype=jnp.int32)
    emb2 = jax.random.normal(k_emb2, (70, input_dim), jnp.float32)
    out2 = jax.block_until_ready(
        graph_prompt_feature_weighted_sum(emb2, graph_len2, weight, rows_per_step=32))
    np.testing.assert_allclose(np.asarray(out2), np.asarray(reference(emb2, graph_len2, weight)),
                               rtol=1e-5, atol=1e-5)

    # Case 3: bf16 streaming path (production dtype) with f32 MXU accumulation.
    emb3 = jax.random.normal(k_emb3, (70, input_dim), jnp.float32).astype(jnp.bfloat16)
    out3 = jax.block_until_ready(graph_prompt_feature_weighted_sum(emb3, graph_len2, weight))
    np.testing.assert_allclose(np.asarray(out3), np.asarray(reference(emb3, graph_len2, weight)),
                               rtol=2e-2, atol=2e-2)

    print("KERNEL_OK")
</pallas_src>

<mosaic_0001>
module attributes {stable_mosaic.version = 11 : i64} {
  func.func @kernel(%arg0: i32, %arg1: i32, %arg2: memref<8x1xi32, #tpu.memory_space<vmem>>, %arg3: memref<8x1xi32, #tpu.memory_space<vmem>>, %arg4: memref<1x128xf32, #tpu.memory_space<vmem>>, %arg5: memref<2x128xf32, #tpu.memory_space<vmem>>, %arg6: memref<1x8x128xf32, #tpu.memory_space<vmem>>) attributes {dimension_semantics = [#tpu.dimension_semantics<parallel>, #tpu.dimension_semantics<arbitrary>], iteration_bounds = array<i64: 1, 1>, scalar_prefetch = 0 : i64, scratch_operands = 0 : i64, tpu.core_type = #tpu.core_type<tc>, window_params = [{pipeline_mode = #tpu.pipeline_mode<synchronous>, transform_indices = @transform_0, window_bounds = array<i64: 8, 1>}, {pipeline_mode = #tpu.pipeline_mode<synchronous>, transform_indices = @transform_1, window_bounds = array<i64: 8, 1>}, {pipeline_mode = #tpu.pipeline_mode<synchronous>, transform_indices = @transform_2, window_bounds = array<i64: 1, 128>}, {transform_indices = @transform_3, window_bounds = array<i64: 2, 128>}, {transform_indices = @transform_4, window_bounds = array<i64: 1, 8, 128>}]} {
    %c0_i32 = arith.constant 0 : i32
    %0 = arith.cmpi eq, %arg1, %c0_i32 : i32
    %1 = arith.extui %0 : i1 to i32
    %c0_i32_0 = arith.constant 0 : i32
    %2 = arith.cmpi ne, %1, %c0_i32_0 : i32
    scf.if %2 {
      %cst = arith.constant 0.000000e+00 : f32
      %12 = vector.broadcast %cst : f32 to vector<8x128xf32>
      %c0 = arith.constant 0 : index
      %c0_5 = arith.constant 0 : index
      %c0_6 = arith.constant 0 : index
      %13 = vector.load %arg6[%c0, %c0_5, %c0_6] : memref<1x8x128xf32, #tpu.memory_space<vmem>>, vector<1x8x128xf32>
      %14 = vector.shape_cast %13 : vector<1x8x128xf32> to vector<8x128xf32>
      %15 = vector.shape_cast %12 : vector<8x128xf32> to vector<1x8x128xf32>
      tpu.vector_store %arg6[%c0, %c0_5, %c0_6], %15 {strides = array<i32>} : memref<1x8x128xf32, #tpu.memory_space<vmem>>, vector<1x8x128xf32>,
    } else {
    }
    %c1_i32 = arith.constant 1 : i32
    %3 = arith.muli %arg0, %c1_i32 : i32
    %4 = arith.addi %3, %arg1 : i32
    %c2_i32 = arith.constant 2 : i32
    %5 = arith.muli %4, %c2_i32 : i32
    %c2_i32_1 = arith.constant 2 : i32
    %6 = arith.cmpi slt, %5, %c2_i32_1 : i32
    %7 = arith.extui %6 : i1 to i32
    %c0_i32_2 = arith.constant 0 : i32
    %8 = arith.cmpi ne, %7, %c0_i32_2 : i32
    scf.if %8 {
      %c2_i32_5 = arith.constant 2 : i32
      %12 = arith.addi %5, %c2_i32_5 : i32
      %c2_i32_6 = arith.constant 2 : i32
      %13 = arith.cmpi sgt, %12, %c2_i32_6 : i32
      %14 = arith.extui %13 : i1 to i32
      %c0_i32_7 = arith.constant 0 : i32
      %15 = arith.cmpi ne, %14, %c0_i32_7 : i32
      scf.if %15 {
        %19 = tpu.iota {dimensions = array<i32: 0>} : vector<2x1xi32>
        %20 = vector.broadcast %5 : i32 to vector<2x1xi32>
        %21 = arith.addi %20, %19 : vector<2x1xi32>
        %c2_i32_9 = arith.constant 2 : i32
        %22 = vector.broadcast %c2_i32_9 : i32 to vector<2x1xi32>
        %23 = arith.cmpi slt, %21, %22 : vector<2x1xi32>
        %c0 = arith.constant 0 : index
        %c0_10 = arith.constant 0 : index
        %24 = vector.load %arg5[%c0, %c0_10] : memref<2x128xf32, #tpu.memory_space<vmem>>, vector<2x128xf32>
        %cst = arith.constant 0.000000e+00 : f32
        %25 = vector.broadcast %cst : f32 to vector<2x128xf32>
        %26 = vector.shape_cast %23 : vector<2x1xi1> to vector<2x1xi1>
        %27 = vector.broadcast %26 : vector<2x1xi1> to vector<2x128xi1>
        %28 = arith.select %27, %24, %25 : vector<2x128xi1>, vector<2x128xf32>
        %29 = tpu.iota {dimensions = array<i32: 1>} : vector<1x2xi32>
        %30 = vector.broadcast %5 : i32 to vector<1x2xi32>
        %31 = arith.addi %30, %29 : vector<1x2xi32>
        %c4_i32 = arith.constant 4 : i32
        %32 = vector.broadcast %c4_i32 : i32 to vector<1x2xi32>
        %33 = arith.muli %31, %32 : vector<1x2xi32>
        %c0_11 = arith.constant 0 : index
        %c0_12 = arith.constant 0 : index
        %34 = vector.load %arg2[%c0_11, %c0_12] : memref<8x1xi32, #tpu.memory_space<vmem>>, vector<8x1xi32>
        %35 = vector.broadcast %33 : vector<1x2xi32> to vector<8x2xi32>
        %36 = vector.broadcast %34 : vector<8x1xi32> to vector<8x2xi32>
        %37 = arith.cmpi sge, %35, %36 : vector<8x2xi32>
        %c0_13 = arith.constant 0 : index
        %c0_14 = arith.constant 0 : index
        %38 = vector.load %arg3[%c0_13, %c0_14] : memref<8x1xi32, #tpu.memory_space<vmem>>, vector<8x1xi32>
        %39 = vector.broadcast %33 : vector<1x2xi32> to vector<8x2xi32>
        %40 = vector.broadcast %38 : vector<8x1xi32> to vector<8x2xi32>
        %41 = arith.cmpi slt, %39, %40 : vector<8x2xi32>
        %42 = arith.andi %37, %41 : vector<8x2xi1>
        %43 = arith.extui %42 : vector<8x2xi1> to vector<8x2xi32>
        %44 = arith.sitofp %43 : vector<8x2xi32> to vector<8x2xf32>
        %c0_15 = arith.constant 0 : index
        %c0_16 = arith.constant 0 : index
        %c0_17 = arith.constant 0 : index
        %45 = vector.load %arg6[%c0_15, %c0_16, %c0_17] : memref<1x8x128xf32, #tpu.memory_space<vmem>>, vector<1x8x128xf32>
        %46 = vector.shape_cast %45 : vector<1x8x128xf32> to vector<8x128xf32>
        %cst_18 = arith.constant dense<0.000000e+00> : vector<8x128xf32>
        %47 = tpu.matmul %44, %28, %cst_18 {dimension_numbers = #tpu.dot_dimension_numbers<[1], [0], [0], [1], [0, 0, 1, 1], [], []>, precision = #tpu.contract_precision<fp32>} : vector<8x2xf32>, vector<2x128xf32>, vector<8x128xf32> -> vector<8x128xf32>
        %48 = arith.addf %46, %47 : vector<8x128xf32>
        %c0_19 = arith.constant 0 : index
        %c0_20 = arith.constant 0 : index
        %c0_21 = arith.constant 0 : index
        %49 = vector.load %arg6[%c0_19, %c0_20, %c0_21] : memref<1x8x128xf32, #tpu.memory_space<vmem>>, vector<1x8x128xf32>
        %50 = vector.shape_cast %49 : vector<1x8x128xf32> to vector<8x128xf32>
        %51 = vector.shape_cast %48 : vector<8x128xf32> to vector<1x8x128xf32>
        tpu.vector_store %arg6[%c0_19, %c0_20, %c0_21], %51 {strides = array<i32>} : memref<1x8x128xf32, #tpu.memory_space<vmem>>, vector<1x8x128xf32>,
      } else {
      }
      %true = arith.constant true
      %16 = arith.xori %13, %true : i1
      %17 = arith.extui %16 : i1 to i32
      %c0_i32_8 = arith.constant 0 : i32
      %18 = arith.cmpi ne, %17, %c0_i32_8 : i32
      scf.if %18 {
        %c0 = arith.constant 0 : index
        %c0_9 = arith.constant 0 : index
        %19 = vector.load %arg5[%c0, %c0_9] : memref<2x128xf32, #tpu.memory_space<vmem>>, vector<2x128xf32>
        %20 = tpu.iota {dimensions = array<i32: 1>} : vector<1x2xi32>
        %21 = vector.broadcast %5 : i32 to vector<1x2xi32>
        %22 = arith.addi %21, %20 : vector<1x2xi32>
        %c4_i32 = arith.constant 4 : i32
        %23 = vector.broadcast %c4_i32 : i32 to vector<1x2xi32>
        %24 = arith.muli %22, %23 : vector<1x2xi32>
        %c0_10 = arith.constant 0 : index
        %c0_11 = arith.constant 0 : index
        %25 = vector.load %arg2[%c0_10, %c0_11] : memref<8x1xi32, #tpu.memory_space<vmem>>, vector<8x1xi32>
        %26 = vector.broadcast %24 : vector<1x2xi32> to vector<8x2xi32>
        %27 = vector.broadcast %25 : vector<8x1xi32> to vector<8x2xi32>
        %28 = arith.cmpi sge, %26, %27 : vector<8x2xi32>
        %c0_12 = arith.constant 0 : index
        %c0_13 = arith.constant 0 : index
        %29 = vector.load %arg3[%c0_12, %c0_13] : memref<8x1xi32, #tpu.memory_space<vmem>>, vector<8x1xi32>
        %30 = vector.broadcast %24 : vector<1x2xi32> to vector<8x2xi32>
        %31 = vector.broadcast %29 : vector<8x1xi32> to vector<8x2xi32>
        %32 = arith.cmpi slt, %30, %31 : vector<8x2xi32>
        %33 = arith.andi %28, %32 : vector<8x2xi1>
        %34 = arith.extui %33 : vector<8x2xi1> to vector<8x2xi32>
        %35 = arith.sitofp %34 : vector<8x2xi32> to vector<8x2xf32>
        %c0_14 = arith.constant 0 : index
        %c0_15 = arith.constant 0 : index
        %c0_16 = arith.constant 0 : index
        %36 = vector.load %arg6[%c0_14, %c0_15, %c0_16] : memref<1x8x128xf32, #tpu.memory_space<vmem>>, vector<1x8x128xf32>
        %37 = vector.shape_cast %36 : vector<1x8x128xf32> to vector<8x128xf32>
        %cst = arith.constant dense<0.000000e+00> : vector<8x128xf32>
        %38 = tpu.matmul %35, %19, %cst {dimension_numbers = #tpu.dot_dimension_numbers<[1], [0], [0], [1], [0, 0, 1, 1], [], []>, precision = #tpu.contract_precision<fp32>} : vector<8x2xf32>, vector<2x128xf32>, vector<8x128xf32> -> vector<8x128xf32>
        %39 = arith.addf %37, %38 : vector<8x128xf32>
        %c0_17 = arith.constant 0 : index
        %c0_18 = arith.constant 0 : index
        %c0_19 = arith.constant 0 : index
        %40 = vector.load %arg6[%c0_17, %c0_18, %c0_19] : memref<1x8x128xf32, #tpu.memory_space<vmem>>, vector<1x8x128xf32>
        %41 = vector.shape_cast %40 : vector<1x8x128xf32> to vector<8x128xf32>
        %42 = vector.shape_cast %39 : vector<8x128xf32> to vector<1x8x128xf32>
        tpu.vector_store %arg6[%c0_17, %c0_18, %c0_19], %42 {strides = array<i32>} : memref<1x8x128xf32, #tpu.memory_space<vmem>>, vector<1x8x128xf32>,
      } else {
      }
    } else {
    }
    %c0_i32_3 = arith.constant 0 : i32
    %9 = arith.cmpi eq, %arg1, %c0_i32_3 : i32
    %10 = arith.extui %9 : i1 to i32
    %c0_i32_4 = arith.constant 0 : i32
    %11 = arith.cmpi ne, %10, %c0_i32_4 : i32
    scf.if %11 {
      %c0 = arith.constant 0 : index
      %c0_5 = arith.constant 0 : index
      %c0_6 = arith.constant 0 : index
      %12 = vector.load %arg6[%c0, %c0_5, %c0_6] : memref<1x8x128xf32, #tpu.memory_space<vmem>>, vector<1x8x128xf32>
      %13 = vector.shape_cast %12 : vector<1x8x128xf32> to vector<8x128xf32>
      %c0_7 = arith.constant 0 : index
      %c0_8 = arith.constant 0 : index
      %14 = vector.load %arg4[%c0_7, %c0_8] : memref<1x128xf32, #tpu.memory_space<vmem>>, vector<1x128xf32>
      %cst = arith.constant 2.000000e-01 : f32
      %15 = vector.broadcast %cst : f32 to vector<1x128xf32>
      %16 = arith.mulf %14, %15 : vector<1x128xf32>
      %17 = vector.broadcast %16 : vector<1x128xf32> to vector<8x128xf32>
      %18 = arith.mulf %13, %17 : vector<8x128xf32>
      %c0_9 = arith.constant 0 : index
      %c0_10 = arith.constant 0 : index
      %c0_11 = arith.constant 0 : index
      %19 = vector.load %arg6[%c0_9, %c0_10, %c0_11] : memref<1x8x128xf32, #tpu.memory_space<vmem>>, vector<1x8x128xf32>
      %20 = vector.shape_cast %19 : vector<1x8x128xf32> to vector<8x128xf32>
      %21 = vector.shape_cast %18 : vector<8x128xf32> to vector<1x8x128xf32>
      tpu.vector_store %arg6[%c0_9, %c0_10, %c0_11], %21 {strides = array<i32>} : memref<1x8x128xf32, #tpu.memory_space<vmem>>, vector<1x8x128xf32>,
    } else {
    }
    return
  }
  func.func @transform_0(%arg0: i32, %arg1: i32) -> (i32, i32) {
    %c0_i32 = arith.constant 0 : i32
    %c0_i32_0 = arith.constant 0 : i32
    %c0_i32_1 = arith.constant 0 : i32
    return %c0_i32, %c0_i32_0 : i32, i32
  }
  func.func @transform_1(%arg0: i32, %arg1: i32) -> (i32, i32) {
    %c0_i32 = arith.constant 0 : i32
    %c0_i32_0 = arith.constant 0 : i32
    %c0_i32_1 = arith.constant 0 : i32
    return %c0_i32, %c0_i32_0 : i32, i32
  }
  func.func @transform_2(%arg0: i32, %arg1: i32) -> (i32, i32) {
    %c0_i32 = arith.constant 0 : i32
    %c0_i32_0 = arith.constant 0 : i32
    %c0_i32_1 = arith.constant 0 : i32
    return %c0_i32, %c0_i32_0 : i32, i32
  }
  func.func @transform_3(%arg0: i32, %arg1: i32) -> (i32, i32) {
    %c1_i32 = arith.constant 1 : i32
    %0 = arith.muli %arg0, %c1_i32 : i32
    %1 = arith.addi %0, %arg1 : i32
    %c0_i32 = arith.constant 0 : i32
    %2 = arith.minsi %1, %c0_i32 : i32
    %c0_i32_0 = arith.constant 0 : i32
    %c0_i32_1 = arith.constant 0 : i32
    return %2, %c0_i32_0 : i32, i32
  }
  func.func @transform_4(%arg0: i32, %arg1: i32) -> (i32, i32, i32) {
    %c0_i32 = arith.constant 0 : i32
    %c0_i32_0 = arith.constant 0 : i32
    %c0_i32_1 = arith.constant 0 : i32
    return %arg0, %c0_i32, %c0_i32_0 : i32, i32, i32
  }
}

</mosaic_0001>

<bundles_post_ra>
// kernel: tpu_custom_call.1
= control target key start
LH: loop header
LB: loop body
LE: loop exit
PB: predicated region body
PF: predicated region fallthrough
CT: control target
= control target key end

     0   :  { %s538_s0 = inlined_call_operand.vmem [shape: s32[8,1], index: 0, kind: input, shape index: {}]   ;;  %s539_s1 = inlined_call_operand.vmem [shape: s32[8,1], index: 1, kind: input, shape index: {}]   ;;  %s540_s2 = inlined_call_operand.vmem [shape: f32[1,128], index: 2, kind: input, shape index: {}]   ;;  %s541_s3 = inlined_call_operand.vmem [shape: f32[2,128], index: 3, kind: input, shape index: {}]   ;;  %s542_s4 = inlined_call_operand.hbm [shape: f32[1,8,128], index: 4, kind: output, shape index: {}]  }
   0x1   :  { %v254_v0 = vld [vmem:[%s538_s0] sm:$0xff] }
   0x2   :  { %9 = vsyncpa [#allocation3], 0  ;;  %v495_v1 = vmov 0   ;;  %v259_v2 = vld [vmem:[%s539_s1] sm:$0xff]  ;;  %vm272_vm0 = vcmask 1041408   ;;  %v249_v10 = vlaneseq  ;;  %vm268_vm3 = vcmask 15360  }
   0x3   :  { %468 = vset.pattern.permute.xlu0 %v495_v1  ;;  %v248_v3 = vld [vmem:[%s541_s3] sm:$0x3]  ;;  %v496_v15 = vmov 0.0   ;;  %s497_s3 = smov [#allocation2]   ;;  %s442_s24 = sshll.u32 %s542_s4, 4  ;;  %s443_s24 = int_to_ptr.hbm [resolvable:$true] %s442_s24 }
   0x4   :  { %256 = vperm.xlu0 %468, %v254_v0   ;;  %v274_v4 = vsel %vm272_vm0, %v248_v3, 0  ;;  %v250_v12 = vand.u32 127, %v249_v10  ;;  %v428_v27 = vld [vmem:[%s540_s2] sm:$0x1]  ;;  %s440_s21 = sshll.u32 %s497_s3, 4  ;;  %s441_s21 = int_to_ptr.vmem [resolvable:$true] %s440_s21 }
   0x5   :  { %v291_v5 = vand.u32 4294901760, %v274_v4  ;;  %v429_v30 = vmul.f32 0.2, %v428_v27 }
   0x6   :  { %v253_v13 = vmul.u32 4, %v250_v12 }
   0x7   :  { %v318_v6 = vsub.f32 %v274_v4, %v291_v5  ;;  %368 = vmatpush.msra.mxu3 %v291_v5  ;;  %292 = vmatpush.msra.mxu0 %v291_v5  ;;  %v431_v35 = vperm.slane %v429_v30, 0 }
   0x9   :  { %v319_v7 = vand.u32 4294901760, %v318_v6  ;;  %345 = vmatpush.msra.mxu2 %v318_v6 }
   0xb   :  { %v320_v8 = vsub.f32 %v318_v6, %v319_v7  ;;  %394 = vmatpush.msrb.mxu0 %v319_v7 }
   0xc   :  { %261 = vperm.xlu0 %468, %v259_v2  }
   0xd   :  { %v321_v9 = vand.u32 4294901760, %v320_v8 }
   0xf   :  { %322 = vmatpush.msra.mxu1 %v321_v9 }
  0x11   :  { %416 = vmatpush.msrb.mxu1 %v291_v5 }
  0x76   :  { %v257_v11 = vpop.permute.xlu0 %256 }
  0x77   :  { %vm258_vm1 = vcmp.ge.s32.totalorder %v253_v13, %v257_v11 }
  0x7e   :  { %v262_v14 = vpop.permute.xlu0 %261 }
  0x7f   :  { %vm263_vm2 = vcmp.lt.s32.totalorder %v253_v13, %v262_v14 }
  0x80   :  { %vm264_vm4 = vmand %vm258_vm1, %vm263_vm2 }
  0x81   :  { %v461_v16 = vsel %vm264_vm4, 1.0, %v496_v15 }
  0x82   :  { %462 = vmatmul.msk.f32.vlgmr.msra.gmra.mxu1 %vm268_vm3, %v461_v16  ;;  %v270_v17 = vsel %vm268_vm3, %v461_v16, 0 }
  0x83   :  { %v294_v18 = vsub.f32 %v270_v17, %v270_v17 }
  0x85   :  { %348 = vmatmul.f32.vlgmr.msra.gmra.mxu2 %v294_v18  ;;  %v295_v19 = vand.u32 4294901760, %v294_v18 }
  0x87   :  { %372 = vmatmul.f32.vlgmr.msra.gmra.mxu3 %v295_v19  ;;  %v296_v20 = vsub.f32 %v294_v18, %v295_v19 }
  0x89   :  { %v297_v21 = vand.u32 4294901760, %v296_v20 }
  0x8a   :  { %464 = vmatmul.msk.f32.vlgmr.msrb.gmra.mxu1 %vm268_vm3, %v461_v16 }
  0x8b   :  { %298 = vmatmul.f32.vlgmr.msra.gmra.mxu0 %v297_v21 }
  0x93   :  { %463 = vmatmul.msk.f32.vlgmr.msrb.gmra.mxu0 %vm268_vm3, %v461_v16 }
  0xff   :  { %v325_v22 = vpop.f32.mrf.mxu1 }
 0x107   :  { %v419_v33 = vpop.f32.mrf.mxu1 }
 0x108   :  { %v299_v23 = vpop.f32.mrf.mxu0  ;;  %v349_v25 = vpop.f32.mrf.mxu2 }
 0x109   :  { %v326_v24 = vadd.f32 %v325_v22, %v299_v23 }
 0x10a   :  { %v373_v28 = vpop.f32.mrf.mxu3 }
 0x10b   :  { %v350_v26 = vadd.f32 %v349_v25, %v326_v24 }
 0x10d   :  { %v374_v29 = vadd.f32 %v373_v28, %v350_v26 }
 0x110   :  { %v397_v31 = vpop.f32.mrf.mxu0 }
 0x111   :  { %v398_v32 = vadd.f32 %v397_v31, %v374_v29 }
 0x113   :  { %v420_v34 = vadd.f32 %v419_v33, %v398_v32 }
 0x115   :  { %v433_v36 = vmul.f32 %v431_v35, %v420_v34 }
 0x117   :  { %434 = vst [vmem:[#allocation2] sm:$0xff] %v433_v36 }
 0x118   :  { %445 = dma.vmem_to_hbm [thread:$0]  %s441_s21, 128, %s443_s24, [#allocation3]  }
 0x119   :  { %493 = dma.done.wait [#allocation3], 128  }
 0x11a   :  { %494 = vsyncadd [#allocation3], 4294967168 }
 0x11b   :  { %450 = vsyncpa [#allocation3], 1 }

</bundles_post_ra>
